<compile_context>
chip_gen: v7x
topology: tpu7x:2x2x1
jax: 0.10.0
libtpu: 0.0.40
codegen_flags: <defaults>
</compile_context>

<pallas_src>
import jax
import jax.numpy as jnp
from jax.experimental import pallas as pl
from jax.experimental.pallas import tpu as pltpu

SEP_TOKEN_ID = 102   # BERT [SEP]
NH = 16              # packed head rows: 0=evi-start, 1=evi-end, 2=ans, 3..10=err, 11..15=pad


# ----------------------------------------------------------------------------
# Pallas kernel: one fused (NH, H) @ (H, ts) matmul, lane-dense f32 output.
# ----------------------------------------------------------------------------
def _heads_kernel(w_ref,     # VMEM (NH, H)  bf16   packed head weights
                  b_ref,     # VMEM (NH, 1)  f32    packed biases
                  h_ref,     # VMEM (H, ts)  bf16   hidden^T token stream
                  out_ref):  # VMEM (NH, ts) f32    per-token logits for all heads
    out_ref[...] = jnp.dot(w_ref[...], h_ref[...],
                           preferred_element_type=jnp.float32) + b_ref[...]


def _round_up(x, m):
    return ((x + m - 1) // m) * m


def _vmem_budget(frac=0.75, fallback_cap=64 * 1024 * 1024):
    """Generation-aware VMEM limit (~96 MiB on v5e/v6e, ~48 MiB on v7x)."""
    try:
        cap = int(pltpu.get_tpu_info().vmem_capacity_bytes)
    except Exception:
        cap = fallback_cap
    return int(cap * frac)


def _pick_ts(H, total_tokens, budget_bytes, nh=NH):
    """Largest 128-multiple token tile fitting the budget; prefer >= 2 grid steps."""
    t128 = max(128, _round_up(total_tokens, 128))
    ts = 128
    while ts * 2 <= t128:
        nxt = ts * 2
        need = 2 * (H * nxt * 2 + nh * nxt * 4) + 2 * (nh * H * 2 + nh * 4)
        if need > budget_bytes:
            break
        ts = nxt
    # v7x has 2 TensorCores sharing the "parallel" grid axis -> keep nb >= 2
    if t128 // ts < 2 and ts > 128:
        ts //= 2
    return ts, _round_up(t128, ts)


def _run_heads_kernel(hidden_T_bf, w_all_bf, b_all, ts=None):
    """hidden_T_bf: (H, T) bf16 token-major hidden states; returns (NH, T) f32."""
    H, T = hidden_T_bf.shape
    vmem_limit = _vmem_budget()
    if ts is None:
        ts, t_pad = _pick_ts(H, T, int(vmem_limit * 0.75))
    else:
        t_pad = _round_up(max(T, ts), ts)
    if t_pad != T:
        hidden_T_bf = jnp.pad(hidden_T_bf, ((0, 0), (0, t_pad - T)))
    nb = t_pad // ts

    grid_spec = pltpu.PrefetchScalarGridSpec(
        num_scalar_prefetch=0,
        grid=(nb,),
        in_specs=[
            pl.BlockSpec((NH, H), lambda i: (0, 0)),   # packed head weights
            pl.BlockSpec((NH, 1), lambda i: (0, 0)),   # packed biases
            pl.BlockSpec((H, ts), lambda i: (0, i)),   # hidden^T token stream
        ],
        out_specs=pl.BlockSpec((NH, ts), lambda i: (0, i)),
    )

    out = pl.pallas_call(
        _heads_kernel,
        grid_spec=grid_spec,
        out_shape=jax.ShapeDtypeStruct((NH, t_pad), jnp.float32),
        compiler_params=pltpu.CompilerParams(
            dimension_semantics=("parallel",),   # token blocks are independent
            vmem_limit_bytes=vmem_limit,
        ),
    )(w_all_bf, b_all, hidden_T_bf)
    return out[:, :T]


def _head_weights(params):
    """Pack evi/ans/err heads into one (NH, H) bf16 weight + (NH, 1) f32 bias."""
    H = params["w_evi"].shape[0]
    w = jnp.zeros((NH, H), jnp.float32)
    w = w.at[0:2, :].set(params["w_evi"].T)
    w = w.at[2, :].set(params["w_ans"][:, 0])
    w = w.at[3:11, :].set(params["w_err"].T)
    b = jnp.zeros((NH, 1), jnp.float32)
    b = b.at[0:2, 0].set(params["b_evi"])
    b = b.at[2, 0].set(params["b_ans"][0])
    b = b.at[3:11, 0].set(params["b_err"])
    return w.astype(jnp.bfloat16), b


# ----------------------------------------------------------------------------
# Synthetic deterministic encoder (plain-JAX glue).
# ----------------------------------------------------------------------------
def synthetic_encoder(params, ids, attention_mask, token_type_ids):
    # TODO(synk): stands in for the pretrained transformer encoder (BERT-like);
    # the real checkpointed encoder cannot be reproduced in-script.
    S = ids.shape[1]
    h = (params["tok_emb"][ids]
         + params["type_emb"][token_type_ids]
         + params["pos_emb"][None, :S, :])
    h = h * attention_mask[..., None]
    h = jnp.tanh(h @ params["w_enc"] + params["b_enc"])
    mu = jnp.mean(h, axis=-1, keepdims=True)
    var = jnp.var(h, axis=-1, keepdims=True)
    return (h - mu) / jnp.sqrt(var + 1e-5)


def init_params(key, hidden=32, vocab=200, max_pos=64):
    ks = jax.random.split(key, 11)
    s = 0.02
    return {
        "tok_emb": s * jax.random.normal(ks[0], (vocab, hidden), jnp.float32),
        "type_emb": s * jax.random.normal(ks[1], (2, hidden), jnp.float32),
        "pos_emb": s * jax.random.normal(ks[2], (max_pos, hidden), jnp.float32),
        "w_enc": s * jax.random.normal(ks[3], (hidden, hidden), jnp.float32),
        "b_enc": s * jax.random.normal(ks[4], (hidden,), jnp.float32),
        "w_ans": s * jax.random.normal(ks[5], (hidden, 1), jnp.float32),
        "b_ans": s * jax.random.normal(ks[6], (1,), jnp.float32),
        "w_evi": s * jax.random.normal(ks[7], (hidden, 2), jnp.float32),
        "b_evi": s * jax.random.normal(ks[8], (2,), jnp.float32),
        "w_err": s * jax.random.normal(ks[9], (hidden, 8), jnp.float32),
        "b_err": s * jax.random.normal(ks[10], (8,), jnp.float32),
    }


# ----------------------------------------------------------------------------
# Full forward mirroring gkMRC.forward.
# ----------------------------------------------------------------------------
def _cross_entropy(logits, labels):
    logp = jax.nn.log_softmax(logits, axis=-1)
    return -jnp.mean(jnp.take_along_axis(logp, labels[:, None], axis=-1))


def _bce(probs, targets):
    p = jnp.clip(probs, 1e-7, 1.0 - 1e-7)
    return -jnp.mean(targets * jnp.log(p) + (1.0 - targets) * jnp.log(1.0 - p))


def gk_mrc_forward(params, input_ids, attention_mask, token_type_ids,
                   ans_label=None, need_evidence=False, need_error_type=False,
                   start_evidences=None, end_evidences=None, error_type_label=None,
                   ts=None):
    B, C, S = input_ids.shape                     # C == 4 answer candidates
    ids = input_ids.reshape(-1, S)
    am = attention_mask.reshape(-1, S)
    tt = token_type_ids.reshape(-1, S)
    hidden = synthetic_encoder(params, ids, am, tt)            # (B*4, S, H) f32
    B4, _, H = hidden.shape

    # tokens on the lane axis: (H, B4*S) bf16 (transpose fuses into the encoder)
    hidden_T_bf = hidden.reshape(B4 * S, H).T.astype(jnp.bfloat16)

    w_all_bf, b_all = _head_weights(params)
    logits = _run_heads_kernel(hidden_T_bf, w_all_bf, b_all, ts=ts)  # (NH, B4*S)
    logits = logits.reshape(NH, B4, S)

    start_logits = logits[0].reshape(-1, 4, S)                 # (B, 4, S)
    end_logits = logits[1].reshape(-1, 4, S)                   # (B, 4, S)
    ans_all = logits[2, :, 0]                                  # answer logit @ [CLS]

    # second-[SEP] selection on the tiny per-token error logits (plain XLA).
    sep_mask = ids == SEP_TOKEN_ID
    csum = jnp.cumsum(sep_mask.astype(jnp.int32), axis=1)
    sel2 = sep_mask & (csum == 2)
    sep_idx = jnp.argmax(sel2.astype(jnp.int32), axis=1)       # (B4,)
    has_sep2 = jnp.any(sel2, axis=1)
    err_bse = jnp.transpose(logits[3:11], (1, 2, 0))           # (B4, S, 8)
    err_all = err_bse[jnp.arange(B4), sep_idx]                 # (B4, 8)
    # rows without a 2nd [SEP]: bias-only logits (matches the zero-hidden reference)
    err_all = jnp.where(has_sep2[:, None], err_all, params["b_err"][None, :])

    # group-max over the batch axis (torch.max(..., dim=0)) in plain XLA.
    ans_pred = jnp.max(ans_all.reshape(-1, 4), axis=0, keepdims=True)   # (1, 4)
    err_pred = jnp.max(err_all.reshape(-1, 4, 8), axis=0)               # (4, 8)

    if ans_label is None:
        return jnp.argmax(ans_pred, axis=1), start_logits, end_logits, err_pred

    ans_loss = _cross_entropy(ans_pred, ans_label)
    evi_loss = 0.0
    if need_evidence:
        start_loss = _bce(jax.nn.sigmoid(start_logits), start_evidences)
        end_loss = _bce(jax.nn.sigmoid(end_logits), end_evidences)
        evi_loss = (start_loss + end_loss) / 2.0
    err_loss = 0.0
    if need_error_type:
        err_loss = _cross_entropy(err_pred, error_type_label)
    return ans_loss + 3.0 * (evi_loss + err_loss)


# ----------------------------------------------------------------------------
# Plain-JAX reference of the head math (verification only; same bf16 rounding).
# ----------------------------------------------------------------------------
def _reference_heads(ids, hidden, params):
    h = hidden.astype(jnp.bfloat16).astype(jnp.float32)
    w_ans = params["w_ans"].astype(jnp.bfloat16).astype(jnp.float32)
    w_evi = params["w_evi"].astype(jnp.bfloat16).astype(jnp.float32)
    w_err = params["w_err"].astype(jnp.bfloat16).astype(jnp.float32)
    ans_all = h[:, 0, :] @ w_ans[:, 0] + params["b_ans"][0]
    evi = jnp.einsum("bsh,hc->bsc", h, w_evi) + params["b_evi"]
    start, end = evi[..., 0], evi[..., 1]
    sep = ids == SEP_TOKEN_ID
    csum = jnp.cumsum(sep.astype(jnp.int32), axis=1)
    sel = (sep & (csum == 2)).astype(h.dtype)
    err_h = jnp.sum(sel[:, :, None] * h, axis=1)
    err_all = err_h @ w_err + params["b_err"]
    ans_g = jnp.max(ans_all.reshape(-1, 4), axis=0)[None]      # (1, 4)
    err_g = jnp.max(err_all.reshape(-1, 4, 8), axis=0)         # (4, 8)
    return ans_g, start, end, err_g


if __name__ == "__main__":
    B, C, S, H = 2, 4, 32, 32          # B*4*S = 256 tokens -> grid of 2 token tiles
    key = jax.random.PRNGKey(0)
    k_ids, k_par, k_s, k_e = jax.random.split(key, 4)

    input_ids = jax.random.randint(k_ids, (B, C, S), 1, 100, dtype=jnp.int32)
    input_ids = input_ids.at[:, :, 0].set(101)                 # [CLS]
    input_ids = input_ids.at[:, :, 3].set(SEP_TOKEN_ID)        # 1st [SEP]
    input_ids = input_ids.at[:, :, S - 1].set(SEP_TOKEN_ID)    # 2nd [SEP]
    attention_mask = jnp.ones((B, C, S), jnp.float32)
    token_type_ids = jnp.broadcast_to(
        (jnp.arange(S) > 3).astype(jnp.int32), (B, C, S))

    params = init_params(k_par, hidden=H, vocab=200, max_pos=S)

    # inference path
    answer, start_logits, end_logits, err_pred = gk_mrc_forward(
        params, input_ids, attention_mask, token_type_ids)
    jax.block_until_ready((answer, start_logits, end_logits, err_pred))

    # training (loss) path
    ans_label = jnp.array([1], jnp.int32)
    start_ev = (jax.random.uniform(k_s, (B, C, S)) > 0.8).astype(jnp.float32)
    end_ev = (jax.random.uniform(k_e, (B, C, S)) > 0.8).astype(jnp.float32)
    err_label = jnp.array([0, 2, 4, 6], jnp.int32)
    loss = gk_mrc_forward(params, input_ids, attention_mask, token_type_ids,
                          ans_label=ans_label, need_evidence=True,
                          need_error_type=True, start_evidences=start_ev,
                          end_evidences=end_ev, error_type_label=err_label)
    jax.block_until_ready(loss)
    assert bool(jnp.isfinite(loss)), "non-finite loss"

    # verify the kernel against a plain-JAX reference on identical bf16-rounded inputs
    ids_flat = input_ids.reshape(-1, S)
    hidden = synthetic_encoder(params, ids_flat,
                               attention_mask.reshape(-1, S),
                               token_type_ids.reshape(-1, S))
    ref_ans, ref_start, ref_end, ref_err = _reference_heads(ids_flat, hidden, params)
    ok = (jnp.allclose(ref_start.reshape(-1, 4, S), start_logits, atol=2e-3, rtol=2e-3)
          and jnp.allclose(ref_end.reshape(-1, 4, S), end_logits, atol=2e-3, rtol=2e-3)
          and jnp.allclose(ref_err, err_pred, atol=2e-3, rtol=2e-3)
          and int(jnp.argmax(ref_ans, axis=1)[0]) == int(answer[0]))
    assert bool(ok), "Pallas kernel mismatch vs reference"
    print("KERNEL_OK")
</pallas_src>

<mosaic_0001>
module attributes {stable_mosaic.version = 11 : i64} {
  func.func @_heads_kernel(%arg0: i32, %arg1: memref<16x32xbf16, #tpu.memory_space<vmem>>, %arg2: memref<16x1xf32, #tpu.memory_space<vmem>>, %arg3: memref<32x128xbf16, #tpu.memory_space<vmem>>, %arg4: memref<16x128xf32, #tpu.memory_space<vmem>>) attributes {dimension_semantics = [#tpu.dimension_semantics<parallel>], iteration_bounds = array<i64: 2>, scalar_prefetch = 0 : i64, scratch_operands = 0 : i64, tpu.core_type = #tpu.core_type<tc>, window_params = [{pipeline_mode = #tpu.pipeline_mode<synchronous>, transform_indices = @transform_0, window_bounds = array<i64: 16, 32>}, {pipeline_mode = #tpu.pipeline_mode<synchronous>, transform_indices = @transform_1, window_bounds = array<i64: 16, 1>}, {transform_indices = @transform_2, window_bounds = array<i64: 32, 128>}, {transform_indices = @transform_3, window_bounds = array<i64: 16, 128>}]} {
    %c0 = arith.constant 0 : index
    %c0_0 = arith.constant 0 : index
    %0 = vector.load %arg1[%c0, %c0_0] : memref<16x32xbf16, #tpu.memory_space<vmem>>, vector<16x32xbf16>
    %c0_1 = arith.constant 0 : index
    %c0_2 = arith.constant 0 : index
    %1 = vector.load %arg3[%c0_1, %c0_2] : memref<32x128xbf16, #tpu.memory_space<vmem>>, vector<32x128xbf16>
    %cst = arith.constant dense<0.000000e+00> : vector<16x128xf32>
    %2 = tpu.matmul %0, %1, %cst {dimension_numbers = #tpu.dot_dimension_numbers<[1], [0], [0], [1], [0, 0, 1, 1], [], []>} : vector<16x32xbf16>, vector<32x128xbf16>, vector<16x128xf32> -> vector<16x128xf32>
    %c0_3 = arith.constant 0 : index
    %c0_4 = arith.constant 0 : index
    %3 = vector.load %arg2[%c0_3, %c0_4] : memref<16x1xf32, #tpu.memory_space<vmem>>, vector<16x1xf32>
    %4 = vector.broadcast %3 : vector<16x1xf32> to vector<16x128xf32>
    %5 = arith.addf %2, %4 : vector<16x128xf32>
    %c0_5 = arith.constant 0 : index
    %c0_6 = arith.constant 0 : index
    %6 = vector.load %arg4[%c0_5, %c0_6] : memref<16x128xf32, #tpu.memory_space<vmem>>, vector<16x128xf32>
    tpu.vector_store %arg4[%c0_5, %c0_6], %5 {strides = array<i32>} : memref<16x128xf32, #tpu.memory_space<vmem>>, vector<16x128xf32>,
    return
  }
  func.func @transform_0(%arg0: i32) -> (i32, i32) {
    %c0_i32 = arith.constant 0 : i32
    %c0_i32_0 = arith.constant 0 : i32
    %c0_i32_1 = arith.constant 0 : i32
    return %c0_i32, %c0_i32_0 : i32, i32
  }
  func.func @transform_1(%arg0: i32) -> (i32, i32) {
    %c0_i32 = arith.constant 0 : i32
    %c0_i32_0 = arith.constant 0 : i32
    %c0_i32_1 = arith.constant 0 : i32
    return %c0_i32, %c0_i32_0 : i32, i32
  }
  func.func @transform_2(%arg0: i32) -> (i32, i32) {
    %c0_i32 = arith.constant 0 : i32
    %c0_i32_0 = arith.constant 0 : i32
    return %c0_i32, %arg0 : i32, i32
  }
  func.func @transform_3(%arg0: i32) -> (i32, i32) {
    %c0_i32 = arith.constant 0 : i32
    %c0_i32_0 = arith.constant 0 : i32
    return %c0_i32, %arg0 : i32, i32
  }
}

</mosaic_0001>

<bundles_post_ra>
// kernel: tpu_custom_call.1
= control target key start
LH: loop header
LB: loop body
LE: loop exit
PB: predicated region body
PF: predicated region fallthrough
CT: control target
= control target key end

     0   :  { %8 = vsyncpa [#allocation3], 0  ;;  %s745_s0 = inlined_call_operand.vmem [shape: bf16[16,32], index: 0, kind: input, shape index: {}]   ;;  %s746_s1 = inlined_call_operand.vmem [shape: f32[16,1], index: 1, kind: input, shape index: {}]   ;;  %s747_s2 = inlined_call_operand.hbm [shape: bf16[32,256], index: 2, kind: input, shape index: {}]   ;;  %s748_s3 = inlined_call_operand.hbm [shape: f32[16,256], index: 3, kind: output, shape index: {}]  }
   0x1   :  { %10 = vsyncpa [#allocation3 + $0x1], 0 }
   0x2   :  { %11 = vsyncpa [#allocation4], 0 }
   0x3   :  { %13 = vsyncpa [#allocation4 + $0x1], 0  ;;  %s572_s12 = smov 0   ;;  %s574_s13 = smov 0  }
   0x4   :  { %s576_s14 = smov 0   ;;  %s578_s15 = smov 0  }
   0x5 LB: > { %s593_s16 = sadd.s32 4294967295, %s539_s15   ;;  %s357_s17 = sadd.s32 4294967294, %s539_s15   ;;  %s539_s15 = sphi %s578_s15, %s762_s15   ;;  %s535_s14 = sphi %s576_s14, %s761_s14   ;;  %s531_s13 = sphi %s574_s13, %s760_s13   ;;  %s527_s12 = sphi %s572_s12, %s759_s12  }
   0x6   : > { %s597_s18 = sadd.s32 1, %s539_s15   ;;  %s68_s19 = sadd.s32 1, %s535_s14 }
   0x7   : > { %s65_s20 = ssub.s32 %s539_s15, %s597_s18  ;;  %p75_p0 = scmp.ne.s32.totalorder %s535_s14, %s531_s13 }
   0x8   : > { %p66_p1 = scmp.eq.s32.totalorder %s65_s20, 0  ;;  %p76_p2 = scmp.eq.s32.totalorder %s539_s15, 0 }
   0x9   : > { %p81_p3 = scmp.ne.s32.totalorder %s531_s13, %s527_s12  ;;  %p82_p4 = scmp.eq.s32.totalorder %s593_s16, 0 }
   0xa   : > { %s609_s21 = scalar_select %p66_p1, %s535_s14, %s68_s19  }
   0xb   : > { %p611_p5 = por %p76_p2, %p75_p0  ;;  %p615_p6 = por %p82_p4, %p81_p3 }
   0xc   : > { %p105_p7 = scmp.eq.s32.totalorder %s593_s16, 1  ;;  %p111_p8 = scmp.eq.s32.totalorder %s357_s17, 1 }
   0xd   : > { %p396_p10 = scmp.lt.s32.totalorder %s539_s15, 2  ;;  %s137_s26 = sand.u32 1, %s535_s14  }
   0xe   : > { %p622_p11 = por %p105_p7, %p75_p0  ;;  %p626_p12 = por %p111_p8, %p81_p3 }
   0xf   : > { %s361_s27 = sshll.u32 %s539_s15, 6  ;;  %s360_s28 = sshll.u32 %s137_s26, 4 }
  0x10   : > { %s752_s24 = scalar_select %p622_p11, 1, 0 }
  0x11   : > { %s753_s25 = scalar_select %p626_p12, 1, 0 }
  0x12   : > { %s635_s4 = scalar_lea.hbm %s747_s2, %s361_s27  ;;  %s141_s5 = scalar_lea.vmem [#allocation2], %s360_s28 }
  0x13   : > { %s147_s6 = sshll.u32 %s141_s5, 4  ;;  %p639_p13 = pnand %p396_p10, %p611_p5  ;;  %s643_s6 = int_to_ptr.vmem [resolvable:$true] %s147_s6 }
  0x14   : > { %s646_s8 = scalar_lea.sflag [#allocation3], %s137_s26  ;;  %s443_s9 = scalar_lea.hbm %s635_s4, 256 }
  0x15   : > { %p444_p1 = scmp.ne.s32.totalorder %s635_s4, %s443_s9  ;;  %p445_p2 = pneg %p639_p13 }
  0x16   : > { %s448_s17 = scalar_lea.hbm %s747_s2, 512  ;;  %p449_p5 = scmp.lt.u32.totalorder %s635_s4, %s747_s2 }
  0x17   : > { %p446_p3 = pnand %p445_p2, %p444_p1  ;;  %p450_p7 = scmp.lt.u32.totalorder %s448_s17, %s443_s9 }
  0x18   : > { %p452_p10 = scmp.lt.u32.totalorder %s443_s9, %s635_s4 }
  0x19   : > { %p447_p4 = pneg %p446_p3  ;;  %p451_p8 = por %p450_p7, %p449_p5 }
  0x1b   : > { %p453_p9 = por %p452_p10, %p451_p8 }
  0x1d   : > { %p454_p0 = pnand %p453_p9, %p447_p4 }
  0x1f   : > { %457 = shalt.err (!%p454_p0)
}
  0x20   : > { %s458_s22 = scalar_lea.vmem %s643_s6, 256  ;;  %s541_s26 = smov [#allocation2]  }
  0x21   : > { %p459_p1 = scmp.ne.s32.totalorder %s643_s6, %s458_s22  ;;  %s463_s27 = sshll.u32 %s541_s26, 4  ;;  %s464_s27 = int_to_ptr.vmem [resolvable:$false] %s463_s27 }
  0x22   : > { %s465_s28 = scalar_lea.vmem %s464_s27, 512  ;;  %p466_p11 = scmp.lt.s32.totalorder %s643_s6, %s464_s27 }
  0x23   : > { %p461_p3 = pnand %p459_p1, %p445_p2  ;;  %p467_p5 = scmp.lt.s32.totalorder %s465_s28, %s458_s22 }
  0x25   : > { %p462_p12 = pneg %p461_p3  ;;  %p468_p7 = por %p467_p5, %p466_p11 }
  0x27   : > { %p469_p8 = pnand %p468_p7, %p462_p12 }
  0x29   : > { %472 = shalt.err (!%p469_p8)
}
  0x2a   : > { %s542_s29 = smov 128   ;;  %s543_s30 = smov 64  }
  0x2b   : > { %s544_s5 = smov 4   ;;  %p155_p9 = scmp.lt.s32.totalorder %s539_s15, 3 }
  0x2c   : > { %391 = dma.hbm_to_vmem [thread:$0]  (!%p639_p13), %s635_s4, 256, %s643_s6, %s646_s8, %s542_s29, %s543_s30, %s544_s5  }
  0x2d   : > { %p755_p0 = scmp.ge.s32.totalorder %s539_s15, 1 }
  0x2f   : > { %p156_p2 = pnand %p755_p0, %p155_p9 }
  0x30   : > { %s678_s9 = sand.u32 (!%p156_p2), 1, %s531_s13  }
  0x31   : > { %159 = sbr.rel (%p156_p2) target bundleno = 298 (0x12a), region = 32  ;;  %s363_s10 = sshll.u32 (!%p156_p2), %s678_s9, 4 }
  0x32   : > { %s162_s11 = scalar_lea.sflag (!%p156_p2), [#allocation3], %s678_s9  ;;  %s165_s17 = scalar_lea.vmem (!%p156_p2), [#allocation2], %s363_s10 }
  0x38   : > { %518 = dma.done.wait (%p615_p6), %s162_s11, 256  }
  0x39   : > { %520 = vsyncadd (%p615_p6), %s162_s11, 4294967040  ;;  %v545_v0 = vmov 0.0   ;;  %vm546_vm0 = vmmov 0   ;;  %v547_v1 = vmov 0   ;;  %v440_v2 = vld [vmem:[%s165_s17] sm:$0xff]   ;;  %v441_v3 = vld [vmem:[%s165_s17 + $0x8] sm:$0xff]  }
  0x3a   : > { %376 = vmatprep.subr.bf16.mxu0 %v545_v0  ;;  %380 = vmatprep.mubr.msk.bf16.mxu0 %vm546_vm0, %v545_v0  ;;  %v195_v4 = vld [vmem:[%s746_s1] sm:$0xff]  ;;  %v196_v6 = vld [vmem:[%s746_s1 + $0x8] sm:$0xff]  ;;  %vm224_vm1 = vcmask 261120   ;;  %s187_s20 = scalar_lea.vmem [#allocation5], %s363_s10  ;;  %s370_s26 = sshll.u32 %s593_s16, 7 }
  0x3b   : > { %439 = vset.pattern.permute.xlu0 %v547_v1  ;;  %377 = vmatpush3.bf16.msra.mxu0 %v440_v2  ;;  %v442_v5 = vld [vmem:[%s745_s0] sm:$0xff]   ;;  %s284_s22 = sshll.u32 %s187_s20, 4  ;;  %s701_s29 = scalar_lea.hbm %s748_s3, %s370_s26  ;;  %s696_s22 = int_to_ptr.vmem [resolvable:$true] %s284_s22 }
  0x3c   : > { %378 = vmatprep.subr.bf16.mxu0 %v545_v0  ;;  %199 = vperm.xlu0 %439, %v195_v4   ;;  %s272_s16 = scalar_lea.sflag [#allocation4], %s678_s9  ;;  %s473_s30 = scalar_lea.vmem %s696_s22, 256 }
  0x3d   : > { %p474_p6 = scmp.ne.s32.totalorder %s696_s22, %s473_s30  ;;  %p756_p11 = scmp.ne.s32.totalorder %s752_s24, 0 }
  0x3e   : > { %s548_s5 = smov [#allocation5]  }
  0x3f   : > { %379 = vmatpush3.bf16.msra.mxu0 %v441_v3  ;;  %p475_p12 = pnand %p474_p6, %p756_p11  ;;  %s477_s10 = sshll.u32 %s548_s5, 4  ;;  %s478_s10 = int_to_ptr.vmem [resolvable:$false] %s477_s10 }
  0x40   : > { %204 = vperm.xlu0 %439, %v196_v6   ;;  %s479_s11 = scalar_lea.vmem %s478_s10, 512  ;;  %p480_p4 = scmp.lt.s32.totalorder %s696_s22, %s478_s10 }
  0x41   : > { %p476_p13 = pneg %p475_p12  ;;  %p481_p10 = scmp.lt.s32.totalorder %s479_s11, %s473_s30 }
  0x42   : > { %381 = vmatmul.mubr.msk.bf16.vlgmr.msra.gmra.mrb[0].mxu0 %vm224_vm1, %v442_v5 }
  0x43   : > { %p482_p1 = por %p481_p10, %p480_p4 }
  0x45   : > { %p483_p3 = pnand %p482_p1, %p476_p13 }
  0xbb   : > { %v200_v7 = vpop.permute.xlu0 %199 }
  0xbf   : > { %v205_v11 = vpop.permute.xlu0 %204 }
 0x115   : > { %v262_v8 = vpop.f32.mrb[0].mxu0 }
 0x116   : > { %v263_v9 = vadd.f32 %v262_v8, %v200_v7  ;;  %v382_v10 = vpop.f32.mrb[1].mxu0 }
 0x117   : > { %v265_v12 = vpop.f32.mrb[2].mxu0 }
 0x118   : > { %269 = vst [vmem:[%s187_s20] sm:$0xff] %v263_v9  ;;  %v266_v13 = vadd.f32 %v265_v12, %v205_v11  ;;  %v383_v14 = vpop.f32.mrb[3].mxu0 }
 0x11a   : > { %270 = vst [vmem:[%s187_s20 + $0x8] sm:$0xff] %v266_v13 }
 0x11b   : > { %486 = shalt.err (!%p483_p3)
}
 0x11c   : > { %s487_s17 = scalar_lea.hbm %s701_s29, 256  ;;  %s491_s7 = scalar_lea.hbm %s748_s3, 512 }
 0x11d   : > { %p488_p5 = scmp.ne.s32.totalorder %s701_s29, %s487_s17  ;;  %p492_p9 = scmp.lt.u32.totalorder %s701_s29, %s748_s3 }
 0x11e   : > { %p493_p0 = scmp.lt.u32.totalorder %s491_s7, %s487_s17  ;;  %p495_p6 = scmp.lt.u32.totalorder %s487_s17, %s701_s29 }
 0x11f   : > { %p489_p7 = pnand %p488_p5, %p756_p11 }
 0x120   : > { %p494_p2 = por %p493_p0, %p492_p9 }
 0x121   : > { %p490_p8 = pneg %p489_p7 }
 0x122   : > { %p496_p12 = por %p495_p6, %p494_p2 }
 0x124   : > { %p497_p13 = pnand %p496_p12, %p490_p8 }
 0x126   : > { %500 = shalt.err (!%p497_p13)
}
 0x127   : > { %s549_s19 = smov 128   ;;  %s550_s20 = smov 256  }
 0x128   : > { %s551_s26 = smov 8  }
 0x129   : > { %386 = dma.vmem_to_hbm [thread:$0]  (%p756_p11), %s696_s22, 256, %s701_s29, %s272_s16, %s549_s19, %s550_s20, %s551_s26  }
 0x12a PF: > { %s299_s27 = sand.u32 1, %s527_s12   ;;  %p757_p4 = scmp.ne.s32.totalorder %s753_s25, 0 }
 0x12b   : > { %p758_p10 = scmp.ge.s32.totalorder %s539_s15, 2  ;;  %s300_s28 = scalar_lea.sflag [#allocation4], %s299_s27 }
 0x12d   : > { %p393_p1 = pnand %p758_p10, %p757_p4 }
 0x12f   : > { %522 = dma.done.wait (!%p393_p1), %s300_s28, 256  }
 0x130   : > { %524 = vsyncadd (!%p393_p1), %s300_s28, 4294967040  ;;  %p16_p3 = scmp.ge.s32.totalorder %s597_s18, 4   ;;  %s759_s12 = smov %s531_s13 }
 0x131   : > { %s760_s13 = smov %s535_s14  ;;  %s761_s14 = smov %s609_s21 }
 0x132   : > { %s762_s15 = smov %s597_s18  ;;  %18 = sbr.rel (!%p16_p3) target bundleno = 5 (0x5), region = 77 }
 0x139   :  { %305 = vsyncpa [#allocation3], 1 }
 0x13a   :  { %307 = vsyncpa [#allocation3 + $0x1], 1 }
 0x13b   :  { %308 = vsyncpa [#allocation4], 1 }
 0x13c   :  { %310 = vsyncpa [#allocation4 + $0x1], 1 }

</bundles_post_ra>
